<compile_context>
chip_gen: v7x
topology: tpu7x:2x2x1
jax: 0.10.0
libtpu: 0.0.40
codegen_flags: <defaults>
</compile_context>

<pallas_src>
import functools

import jax
import jax.numpy as jnp
from jax import lax
from jax.experimental import pallas as pl
from jax.experimental.pallas import tpu as pltpu


def _round_up(x, m):
    return ((x + m - 1) // m) * m


def _sse_kernel(true_ref, fake_ref, out_ref, *, rows, block_rows, chunk_rows,
                acc_rows, nb, nb_per_chunk, needs_mask):
    """Accumulate per-sample (acc_rows, 128) partial sums of squared (clamped) error."""
    c = pl.program_id(1)
    j = pl.program_id(2)

    @pl.when(j == 0)
    def _():
        out_ref[...] = jnp.zeros_like(out_ref)

    b = c * nb_per_chunk + j                 # absolute row-block index
    valid0 = rows - b * block_rows           # valid rows in this block (<=0 => duplicate block)

    n_inner = block_rows // chunk_rows
    row_ids = (lax.broadcasted_iota(jnp.int32, (chunk_rows, 128), 0)
               if needs_mask else None)

    def chunk_sse(t, f, valid):
        if not jnp.issubdtype(t.dtype, jnp.floating):
            t = t.astype(jnp.float32)
            f = f.astype(jnp.float32)
        # Clamp in native dtype (bf16 clamps cost half the VALU slots), widen to f32.
        # data_range scaling is deferred to the epilogue: err *= data_range**2.
        t = jnp.clip(t, 0.0, 1.0).astype(jnp.float32)
        f = jnp.clip(f, 0.0, 1.0).astype(jnp.float32)
        d = t - f
        sq = d * d                                       # pure VPU, (chunk_rows, 128)
        if needs_mask:
            # Garbage tail of a ragged/duplicate block contributes zero SSE.
            sq = jnp.where(row_ids < valid, sq, 0.0)
        # Fold into acc_rows independent per-lane partial sums (vreg-wise adds,
        # several independent chains -> throughput-bound, not add-latency-bound).
        return sq.reshape(chunk_rows // acc_rows, acc_rows, 128).sum(axis=0)

    if n_inner == 1:
        out_ref[...] += chunk_sse(true_ref[...], fake_ref[...], valid0)
    else:
        def body(i, acc):
            off = pl.multiple_of(i * chunk_rows, chunk_rows)
            t = true_ref[pl.ds(off, chunk_rows), :]
            f = fake_ref[pl.ds(off, chunk_rows), :]
            return acc + chunk_sse(t, f, valid0 - off)

        acc0 = jnp.zeros((acc_rows, 128), jnp.float32)
        out_ref[...] += lax.fori_loop(0, n_inner, body, acc0,
                                      unroll=True if n_inner <= 8 else 4)


def loss_psnr(im_true, im_fake, data_range=255.0, block_bytes=8 * 1024 * 1024):
    """PSNR loss matching the PyTorch Loss_PSNR.forward semantics.

    Note: identical inputs give err == 0 -> inf PSNR, same as the PyTorch reference.
    """
    assert im_true.shape == im_fake.shape
    N, C, H, W = im_true.shape
    D = C * H * W
    itemsize = jnp.dtype(im_true.dtype).itemsize
    sublane = max(8, 32 // itemsize)          # 8 f32 / 16 bf16 / 32 int8
    lane_pad_unit = 128 * sublane

    it = im_true.reshape(N, D)
    ifk = im_fake.reshape(N, D)

    # Pad (HBM copy) ONLY when required for the lane-dense (rows, 128) view or when
    # the image is too tiny to tile. Padding is zero on both inputs -> zero SSE.
    if D % 128 != 0 or D < lane_pad_unit:
        Dp = _round_up(D, lane_pad_unit)
        it = jnp.pad(it, ((0, 0), (0, Dp - D)))
        ifk = jnp.pad(ifk, ((0, 0), (0, Dp - D)))
    else:
        Dp = D
    rows = Dp // 128
    it = it.reshape(N, rows, 128)
    ifk = ifk.reshape(N, rows, 128)

    # Accumulator width / block-row granularity (step is a multiple of acc_rows and
    # of the packed sublane tile for this dtype).
    if rows >= 256:
        acc_rows, step = 64, 256
    elif rows >= 32:
        acc_rows, step = 32, 32
    else:
        acc_rows, step = sublane, sublane

    # Block rows targeting ~block_bytes per input block; never exceed the array
    # (last block may still be ragged -> masked in-kernel, no wrapper pad).
    r_target = max(step, (block_bytes // (128 * itemsize)) // step * step)
    R = min(r_target, (rows // step) * step)
    nb = pl.cdiv(rows, R)
    chunk_rows = min(R, 256)                  # inner compute chunk (bounds f32 temps)

    # Split the reduction into 2 parallel chunks so both v7x TCs stream for N==1/odd N.
    nc = 2 if nb >= 2 else 1
    nb_c = pl.cdiv(nb, nc)
    needs_mask = (nb * R != rows) or (nc * nb_c != nb)

    def in_index(i, c, j):
        # Clamp duplicate trailing blocks in range; the kernel masks them to zero.
        return (i, jnp.minimum(c * nb_c + j, nb - 1), 0)

    def out_index(i, c, j):
        return (i, c, 0, 0)

    kernel = functools.partial(
        _sse_kernel, rows=rows, block_rows=R, chunk_rows=chunk_rows,
        acc_rows=acc_rows, nb=nb, nb_per_chunk=nb_c, needs_mask=needs_mask)

    in_block_bytes = R * 128 * itemsize
    vmem_limit = int(min(56 << 20, max(16 << 20, 4 * in_block_bytes + (8 << 20))))

    cost = pl.CostEstimate(
        flops=8 * N * rows * 128,
        transcendentals=0,
        bytes_accessed=2 * N * rows * 128 * itemsize + N * nc * acc_rows * 128 * 4,
    )

    sse_partials = pl.pallas_call(
        kernel,
        out_shape=jax.ShapeDtypeStruct((N, nc, acc_rows, 128), jnp.float32),
        grid_spec=pltpu.PrefetchScalarGridSpec(
            num_scalar_prefetch=0,
            grid=(N, nc, nb_c),
            in_specs=[
                pl.BlockSpec((None, R, 128), in_index),
                pl.BlockSpec((None, R, 128), in_index),
            ],
            out_specs=pl.BlockSpec((None, None, acc_rows, 128), out_index),
        ),
        compiler_params=pltpu.CompilerParams(
            dimension_semantics=("parallel", "parallel", "arbitrary"),
            vmem_limit_bytes=vmem_limit,
        ),
        cost_estimate=cost,
    )(it, ifk)

    # Tiny final cross-lane reduce + deferred data_range^2 scale + log + batch mean in XLA.
    sse = jnp.sum(sse_partials.reshape(N, -1), axis=1)
    err = sse * (float(data_range) * float(data_range)) / D     # per-sample MSE
    psnr = 10.0 * jnp.log((float(data_range) ** 2) / err) / jnp.log(10.0)
    return jnp.mean(psnr)


def _reference(im_true, im_fake, data_range=255.0):
    N, C, H, W = im_true.shape
    D = C * H * W
    t = jnp.clip(im_true.astype(jnp.float32), 0.0, 1.0).reshape(N, D) * data_range
    f = jnp.clip(im_fake.astype(jnp.float32), 0.0, 1.0).reshape(N, D) * data_range
    err = jnp.sum((t - f) ** 2, axis=1) / D
    psnr = 10.0 * jnp.log((data_range ** 2) / err) / jnp.log(10.0)
    return jnp.mean(psnr)


if __name__ == "__main__":
    key = jax.random.PRNGKey(0)

    cases = [
        # (shape, block_bytes override) — small shapes chosen to exercise every path:
        ((2, 4, 16, 16), None),           # D=1024:  single full block, no mask
        ((2, 3, 10, 10), None),           # D=300:   lane-pad fallback path
        ((1, 3, 64, 64), 32 * 128 * 4),   # D=12288: nb=3, chunk split + duplicate block masked
        ((2, 5, 32, 32), None),           # D=5120:  ragged last block masked
        ((1, 4, 128, 128), None),         # D=65536: inner fori_loop (2 x 256-row chunks)
    ]
    for idx, (shape, bb) in enumerate(cases):
        key, k1, k2 = jax.random.split(key, 3)
        a = jax.random.uniform(k1, shape, dtype=jnp.float32, minval=-0.2, maxval=1.2)
        b = jax.random.uniform(k2, shape, dtype=jnp.float32, minval=-0.2, maxval=1.2)
        kwargs = {} if bb is None else {"block_bytes": bb}
        out = loss_psnr(a, b, data_range=255.0, **kwargs)
        jax.block_until_ready(out)
        ref = _reference(a, b, data_range=255.0)
        assert jnp.allclose(out, ref, rtol=1e-4, atol=1e-3), (idx, out, ref)

    print("KERNEL_OK")
</pallas_src>

<mosaic_0001>
module attributes {stable_mosaic.version = 11 : i64} {
  func.func @_sse_kernel(%arg0: i32, %arg1: i32, %arg2: i32, %arg3: memref<1x8x128xf32, #tpu.memory_space<vmem>>, %arg4: memref<1x8x128xf32, #tpu.memory_space<vmem>>, %arg5: memref<1x1x8x128xf32, #tpu.memory_space<vmem>>) attributes {dimension_semantics = [#tpu.dimension_semantics<parallel>, #tpu.dimension_semantics<parallel>, #tpu.dimension_semantics<arbitrary>], iteration_bounds = array<i64: 2, 1, 1>, scalar_prefetch = 0 : i64, scratch_operands = 0 : i64, tpu.core_type = #tpu.core_type<tc>, window_params = [{transform_indices = @transform_0, window_bounds = array<i64: 1, 8, 128>}, {transform_indices = @transform_1, window_bounds = array<i64: 1, 8, 128>}, {transform_indices = @transform_2, window_bounds = array<i64: 1, 1, 8, 128>}]} {
    %c0_i32 = arith.constant 0 : i32
    %0 = arith.cmpi eq, %arg2, %c0_i32 : i32
    %1 = arith.extui %0 : i1 to i32
    %c0_i32_0 = arith.constant 0 : i32
    %2 = arith.cmpi ne, %1, %c0_i32_0 : i32
    scf.if %2 {
      %cst_18 = arith.constant 0.000000e+00 : f32
      %25 = vector.broadcast %cst_18 : f32 to vector<8x128xf32>
      %c0_19 = arith.constant 0 : index
      %c0_20 = arith.constant 0 : index
      %c0_21 = arith.constant 0 : index
      %c0_22 = arith.constant 0 : index
      %26 = vector.load %arg5[%c0_19, %c0_20, %c0_21, %c0_22] : memref<1x1x8x128xf32, #tpu.memory_space<vmem>>, vector<1x1x8x128xf32>
      %27 = vector.shape_cast %26 : vector<1x1x8x128xf32> to vector<8x128xf32>
      %28 = vector.shape_cast %25 : vector<8x128xf32> to vector<1x1x8x128xf32>
      tpu.vector_store %arg5[%c0_19, %c0_20, %c0_21, %c0_22], %28 {strides = array<i32>} : memref<1x1x8x128xf32, #tpu.memory_space<vmem>>, vector<1x1x8x128xf32>,
    } else {
    }
    %c0 = arith.constant 0 : index
    %c0_1 = arith.constant 0 : index
    %c0_2 = arith.constant 0 : index
    %c0_3 = arith.constant 0 : index
    %3 = vector.load %arg5[%c0, %c0_1, %c0_2, %c0_3] : memref<1x1x8x128xf32, #tpu.memory_space<vmem>>, vector<1x1x8x128xf32>
    %4 = vector.shape_cast %3 : vector<1x1x8x128xf32> to vector<8x128xf32>
    %c0_4 = arith.constant 0 : index
    %c0_5 = arith.constant 0 : index
    %c0_6 = arith.constant 0 : index
    %5 = vector.load %arg3[%c0_4, %c0_5, %c0_6] : memref<1x8x128xf32, #tpu.memory_space<vmem>>, vector<1x8x128xf32>
    %6 = vector.shape_cast %5 : vector<1x8x128xf32> to vector<8x128xf32>
    %c0_7 = arith.constant 0 : index
    %c0_8 = arith.constant 0 : index
    %c0_9 = arith.constant 0 : index
    %7 = vector.load %arg4[%c0_7, %c0_8, %c0_9] : memref<1x8x128xf32, #tpu.memory_space<vmem>>, vector<1x8x128xf32>
    %8 = vector.shape_cast %7 : vector<1x8x128xf32> to vector<8x128xf32>
    %cst = arith.constant 0.000000e+00 : f32
    %cst_10 = arith.constant 1.000000e+00 : f32
    %9 = vector.broadcast %cst : f32 to vector<8x128xf32>
    %10 = arith.maximumf %9, %6 : vector<8x128xf32>
    %11 = vector.broadcast %cst_10 : f32 to vector<8x128xf32>
    %12 = arith.minimumf %11, %10 : vector<8x128xf32>
    %cst_11 = arith.constant 0.000000e+00 : f32
    %cst_12 = arith.constant 1.000000e+00 : f32
    %13 = vector.broadcast %cst_11 : f32 to vector<8x128xf32>
    %14 = arith.maximumf %13, %8 : vector<8x128xf32>
    %15 = vector.broadcast %cst_12 : f32 to vector<8x128xf32>
    %16 = arith.minimumf %15, %14 : vector<8x128xf32>
    %17 = arith.subf %12, %16 : vector<8x128xf32>
    %18 = arith.mulf %17, %17 : vector<8x128xf32>
    %19 = vector.shape_cast %18 : vector<8x128xf32> to vector<1x8x128xf32>
    %cst_13 = arith.constant dense<0.000000e+00> : vector<8x128xf32>
    %20 = vector.multi_reduction <add>, %19, %cst_13 [0] : vector<1x8x128xf32> to vector<8x128xf32>
    %21 = arith.addf %4, %20 : vector<8x128xf32>
    %c0_14 = arith.constant 0 : index
    %c0_15 = arith.constant 0 : index
    %c0_16 = arith.constant 0 : index
    %c0_17 = arith.constant 0 : index
    %22 = vector.load %arg5[%c0_14, %c0_15, %c0_16, %c0_17] : memref<1x1x8x128xf32, #tpu.memory_space<vmem>>, vector<1x1x8x128xf32>
    %23 = vector.shape_cast %22 : vector<1x1x8x128xf32> to vector<8x128xf32>
    %24 = vector.shape_cast %21 : vector<8x128xf32> to vector<1x1x8x128xf32>
    tpu.vector_store %arg5[%c0_14, %c0_15, %c0_16, %c0_17], %24 {strides = array<i32>} : memref<1x1x8x128xf32, #tpu.memory_space<vmem>>, vector<1x1x8x128xf32>,
    return
  }
  func.func @transform_0(%arg0: i32, %arg1: i32, %arg2: i32) -> (i32, i32, i32) {
    %c1_i32 = arith.constant 1 : i32
    %0 = arith.muli %arg1, %c1_i32 : i32
    %1 = arith.addi %0, %arg2 : i32
    %c0_i32 = arith.constant 0 : i32
    %2 = arith.minsi %1, %c0_i32 : i32
    %c0_i32_0 = arith.constant 0 : i32
    %c0_i32_1 = arith.constant 0 : i32
    return %arg0, %2, %c0_i32_0 : i32, i32, i32
  }
  func.func @transform_1(%arg0: i32, %arg1: i32, %arg2: i32) -> (i32, i32, i32) {
    %c1_i32 = arith.constant 1 : i32
    %0 = arith.muli %arg1, %c1_i32 : i32
    %1 = arith.addi %0, %arg2 : i32
    %c0_i32 = arith.constant 0 : i32
    %2 = arith.minsi %1, %c0_i32 : i32
    %c0_i32_0 = arith.constant 0 : i32
    %c0_i32_1 = arith.constant 0 : i32
    return %arg0, %2, %c0_i32_0 : i32, i32, i32
  }
  func.func @transform_2(%arg0: i32, %arg1: i32, %arg2: i32) -> (i32, i32, i32, i32) {
    %c0_i32 = arith.constant 0 : i32
    %c0_i32_0 = arith.constant 0 : i32
    %c0_i32_1 = arith.constant 0 : i32
    return %arg0, %arg1, %c0_i32, %c0_i32_0 : i32, i32, i32, i32
  }
}

</mosaic_0001>

<bundles_post_ra>
// kernel: tpu_custom_call.1
= control target key start
LH: loop header
LB: loop body
LE: loop exit
PB: predicated region body
PF: predicated region fallthrough
CT: control target
= control target key end

     0   :  { %7 = vsyncpa [#allocation3], 0  ;;  %s856_s0 = inlined_call_operand.hbm [shape: f32[2,8,128], index: 0, kind: input, shape index: {}]   ;;  %s857_s1 = inlined_call_operand.hbm [shape: f32[2,8,128], index: 1, kind: input, shape index: {}]   ;;  %s858_s2 = inlined_call_operand.hbm [shape: f32[2,1,8,128], index: 2, kind: output, shape index: {}]  }
   0x1   :  { %9 = vsyncpa [#allocation3 + $0x1], 0 }
   0x2   :  { %10 = vsyncpa [#allocation6], 0 }
   0x3   :  { %12 = vsyncpa [#allocation6 + $0x1], 0 }
   0x4   :  { %13 = vsyncpa [#allocation4], 0 }
   0x5   :  { %15 = vsyncpa [#allocation4 + $0x1], 0  ;;  %s636_s9 = smov 0   ;;  %s638_s10 = smov 0  }
   0x6   :  { %s640_s11 = smov 0   ;;  %s642_s12 = smov 0  }
   0x7   :  { %s644_s13 = smov 0   ;;  %s646_s14 = smov 0  }
   0x8 LB: > { %s386_s15 = sadd.s32 4294967295, %s616_s14   ;;  %s387_s16 = sadd.s32 4294967294, %s616_s14   ;;  %s616_s14 = sphi %s646_s14, %s21_s14   ;;  %s612_s13 = sphi %s644_s13, %s878_s13   ;;  %s608_s12 = sphi %s642_s12, %s877_s12   ;;  %s604_s11 = sphi %s640_s11, %s876_s11   ;;  %s600_s10 = sphi %s638_s10, %s875_s10   ;;  %s596_s9 = sphi %s636_s9, %s874_s9  }
   0x9   : > { %s40_s17 = sadd.s32 1, %s612_s13  ;;  %s55_s18 = sadd.s32 1, %s604_s11 }
   0xa   : > { %p42_p0 = scmp.ge.s32.totalorder %s40_s17, 2  ;;  %p62_p1 = scmp.ne.s32.totalorder %s604_s11, %s600_s10 }
   0xb   : > { %p63_p2 = scmp.eq.s32.totalorder %s616_s14, 0  ;;  %p68_p3 = scmp.ne.s32.totalorder %s600_s10, %s596_s9 }
   0xc   : > { %s880_s17 = smov (%p42_p0, %s40_s17), 0  ;;  %p69_p5 = scmp.eq.s32.totalorder %s386_s15, 0 }
   0xd   : > { %p677_p4 = por %p63_p2, %p62_p1  ;;  %s50_s20 = ssub.s32 %s612_s13, %s880_s17 }
   0xe   : > { %p128_p6 = scmp.eq.s32.totalorder %s386_s15, 1  ;;  %p53_p7 = scmp.eq.s32.totalorder %s50_s20, 0 }
   0xf   : > { %p683_p8 = por %p69_p5, %p68_p3  ;;  %p134_p10 = scmp.eq.s32.totalorder %s387_s16, 1 }
  0x10   : > { %p687_p9 = por %p128_p6, %p62_p1  ;;  %p419_p13 = scmp.lt.s32.totalorder %s616_s14, 2 }
  0x11   : > { %s862_s21 = scalar_select %p683_p8, 1, 0 }
  0x12   : > { %s863_s22 = scalar_select %p687_p9, 1, 0 }
  0x13   : > { %s692_s23 = scalar_select %p53_p7, %s604_s11, %s55_s18  }
  0x14   : > { %p694_p11 = por %p134_p10, %p68_p3  ;;  %s701_s25 = sand.u32 1, %s604_s11  }
  0x15   : > { %s390_s26 = sshll.u32 %s701_s25, 3  ;;  %s391_s27 = sshll.u32 %s612_s13, 7 }
  0x16   : > { %s864_s24 = scalar_select %p694_p11, 1, 0 }
  0x17   : > { %s710_s30 = scalar_lea.hbm %s856_s0, %s391_s27  ;;  %s158_s3 = scalar_lea.vmem [#allocation2], %s390_s26 }
  0x18   : > { %s169_s4 = sshll.u32 %s158_s3, 4  ;;  %p718_p0 = pnand %p419_p13, %p677_p4  ;;  %s714_s4 = int_to_ptr.vmem [resolvable:$true] %s169_s4 }
  0x19   : > { %s155_s6 = scalar_lea.sflag [#allocation3], %s701_s25  ;;  %s470_s7 = scalar_lea.hbm %s710_s30, 128 }
  0x1a   : > { %p471_p3 = scmp.ne.s32.totalorder %s710_s30, %s470_s7  ;;  %p472_p5 = pneg %p718_p0 }
  0x1b   : > { %s475_s16 = scalar_lea.hbm %s856_s0, 256  ;;  %p476_p4 = scmp.lt.u32.totalorder %s710_s30, %s856_s0 }
  0x1c   : > { %p473_p6 = pnand %p472_p5, %p471_p3  ;;  %p477_p10 = scmp.lt.u32.totalorder %s475_s16, %s470_s7 }
  0x1d   : > { %p479_p12 = scmp.lt.u32.totalorder %s470_s7, %s710_s30 }
  0x1e   : > { %p474_p7 = pneg %p473_p6  ;;  %p478_p13 = por %p477_p10, %p476_p4 }
  0x20   : > { %p480_p1 = por %p479_p12, %p478_p13 }
  0x22   : > { %p481_p2 = pnand %p480_p1, %p474_p7 }
  0x24   : > { %484 = shalt.err (!%p481_p2)
}
  0x25   : > { %s485_s20 = scalar_lea.vmem %s714_s4, 128  ;;  %s618_s28 = smov [#allocation2]  }
  0x26   : > { %p486_p3 = scmp.ne.s32.totalorder %s714_s4, %s485_s20  ;;  %s490_s29 = sshll.u32 %s618_s28, 4  ;;  %s491_s29 = int_to_ptr.vmem [resolvable:$false] %s490_s29 }
  0x27   : > { %s492_s3 = scalar_lea.vmem %s491_s29, 256  ;;  %p493_p9 = scmp.lt.s32.totalorder %s714_s4, %s491_s29 }
  0x28   : > { %p488_p6 = pnand %p486_p3, %p472_p5  ;;  %p494_p4 = scmp.lt.s32.totalorder %s492_s3, %s485_s20 }
  0x2a   : > { %p489_p11 = pneg %p488_p6  ;;  %p495_p10 = por %p494_p4, %p493_p9 }
  0x2c   : > { %p496_p12 = pnand %p495_p10, %p489_p11 }
  0x2e   : > { %499 = shalt.err (!%p496_p12)
}
  0x2f   : > { %411 = dma.hbm_to_vmem [thread:$0]  (!%p718_p0), %s710_s30, 128, %s714_s4, %s155_s6  }
  0x30   : > { %p866_p1 = scmp.lt.s32.totalorder %s616_s14, 3  ;;  %p867_p2 = scmp.ge.s32.totalorder %s616_s14, 1 }
  0x31   : > { %s763_s16 = scalar_lea.hbm %s857_s1, %s391_s27  ;;  %s180_s18 = scalar_lea.vmem [#allocation5], %s390_s26 }
  0x32   : > { %p754_p7 = pnand %p867_p2, %p866_p1  ;;  %s191_s19 = sshll.u32 %s180_s18, 4  ;;  %s192_s19 = int_to_ptr.vmem [resolvable:$true] %s191_s19 }
  0x33   : > { %s177_s30 = scalar_lea.sflag [#allocation6], %s701_s25  ;;  %s500_s4 = scalar_lea.hbm %s763_s16, 128 }
  0x34   : > { %s868_s7 = scalar_select %p754_p7, 1, 0 }
  0x35   : > { %p501_p9 = scmp.ne.s32.totalorder %s763_s16, %s500_s4  ;;  %s505_s27 = scalar_lea.hbm %s857_s1, 256 }
  0x36   : > { %p506_p3 = scmp.lt.u32.totalorder %s763_s16, %s857_s1  ;;  %p507_p6 = scmp.lt.u32.totalorder %s505_s27, %s500_s4 }
  0x37   : > { %p503_p11 = pnand %p501_p9, %p472_p5  ;;  %p509_p10 = scmp.lt.u32.totalorder %s500_s4, %s763_s16 }
  0x38   : > { %p508_p4 = por %p507_p6, %p506_p3 }
  0x39   : > { %p504_p13 = pneg %p503_p11 }
  0x3a   : > { %p510_p12 = por %p509_p10, %p508_p4 }
  0x3c   : > { %p511_p1 = pnand %p510_p12, %p504_p13 }
  0x3e   : > { %514 = shalt.err (!%p511_p1)
}
  0x3f   : > { %s515_s25 = scalar_lea.vmem %s192_s19, 128  ;;  %s619_s26 = smov [#allocation5]  }
  0x40   : > { %p516_p2 = scmp.ne.s32.totalorder %s192_s19, %s515_s25  ;;  %s520_s3 = sshll.u32 %s619_s26, 4  ;;  %s521_s3 = int_to_ptr.vmem [resolvable:$false] %s520_s3 }
  0x41   : > { %s522_s8 = scalar_lea.vmem %s521_s3, 256  ;;  %p523_p8 = scmp.lt.s32.totalorder %s192_s19, %s521_s3 }
  0x42   : > { %p518_p9 = pnand %p516_p2, %p472_p5  ;;  %p524_p7 = scmp.lt.s32.totalorder %s522_s8, %s515_s25 }
  0x44   : > { %p519_p11 = pneg %p518_p9  ;;  %p525_p3 = por %p524_p7, %p523_p8 }
  0x46   : > { %p526_p6 = pnand %p525_p3, %p519_p11 }
  0x48   : > { %529 = shalt.err (!%p526_p6)
}
  0x49   : > { %414 = dma.hbm_to_vmem [thread:$0]  (!%p718_p0), %s763_s16, 128, %s192_s19, %s177_s30  }
  0x4a   : > { %p869_p13 = scmp.ne.s32.totalorder %s868_s7, 0 }
  0x4b   : > { %s790_s15 = sand.u32 (!%p869_p13), 1, %s600_s10   ;;  %p870_p5 = scmp.ne.s32.totalorder (!%p869_p13), %s862_s21, 0 }
  0x4c   : > { %200 = sbr.rel (%p869_p13) target bundleno = 112 (0x70), region = 28  ;;  %s395_s18 = sshll.u32 (!%p869_p13), %s790_s15, 3 }
  0x4d   : > { %s203_s4 = scalar_lea.sflag (!%p869_p13), [#allocation3], %s790_s15  ;;  %s206_s6 = scalar_lea.vmem (!%p869_p13), [#allocation2], %s395_s18 }
  0x53   : > { %583 = dma.done.wait (%p870_p5), %s203_s4, 128  }
  0x54   : > { %585 = vsyncadd (%p870_p5), %s203_s4, 4294967168  ;;  %s212_s5 = scalar_lea.sflag [#allocation6], %s790_s15  ;;  %s215_s16 = scalar_lea.vmem [#allocation5], %s395_s18 }
  0x55   : > { %587 = dma.done.wait (%p870_p5), %s212_s5, 128  }
  0x56   : > { %589 = vsyncadd (%p870_p5), %s212_s5, 4294967168  ;;  %v253_v0 = vld [vmem:[%s206_s6] sm:$0xff]  ;;  %v254_v1 = vld [vmem:[%s215_s16] sm:$0xff]  ;;  %s399_s7 = sshll.u32 %s608_s12, 7  ;;  %s240_s19 = scalar_lea.vmem [#allocation7], %s395_s18 }
  0x57   : > { %v255_v2 = vmax.f32 %v253_v0, 0.0  ;;  %v257_v3 = vmax.f32 %v254_v1, 0.0  ;;  %s279_s30 = sshll.u32 %s240_s19, 4  ;;  %s807_s28 = scalar_lea.hbm %s858_s2, %s399_s7  ;;  %s809_s30 = int_to_ptr.vmem [resolvable:$true] %s279_s30 }
  0x58   : > { %s265_s21 = scalar_lea.sflag [#allocation4], %s790_s15  ;;  %s530_s29 = scalar_lea.vmem %s809_s30, 128 }
  0x59   : > { %v256_v4 = vmin.f32 %v255_v2, 1.0  ;;  %v258_v5 = vmin.f32 %v257_v3, 1.0  ;;  %p531_p8 = scmp.ne.s32.totalorder %s809_s30, %s530_s29  ;;  %p871_p0 = scmp.ne.s32.totalorder %s863_s22, 0 }
  0x5a   : > { %s620_s12 = smov [#allocation7]  }
  0x5b   : > { %v259_v6 = vsub.f32 %v256_v4, %v258_v5  ;;  %p532_p7 = pnand %p531_p8, %p871_p0  ;;  %s534_s25 = sshll.u32 %s620_s12, 4  ;;  %s535_s25 = int_to_ptr.vmem [resolvable:$false] %s534_s25 }
  0x5c   : > { %s536_s26 = scalar_lea.vmem %s535_s25, 256  ;;  %p537_p10 = scmp.lt.s32.totalorder %s809_s30, %s535_s25 }
  0x5d   : > { %v260_v7 = vmul.f32 %v259_v6, %v259_v6  ;;  %p533_p4 = pneg %p532_p7  ;;  %p538_p12 = scmp.lt.s32.totalorder %s536_s26, %s530_s29 }
  0x5f   : > { %263 = vst [vmem:[%s240_s19] sm:$0xff] %v260_v7  ;;  %p539_p1 = por %p538_p12, %p537_p10 }
  0x61   : > { %p540_p2 = pnand %p539_p1, %p533_p4 }
  0x63   : > { %543 = shalt.err (!%p540_p2)
}
  0x64   : > { %s544_s3 = scalar_lea.hbm %s807_s28, 128  ;;  %s548_s18 = scalar_lea.hbm %s858_s2, 256 }
  0x65   : > { %p545_p9 = scmp.ne.s32.totalorder %s807_s28, %s544_s3  ;;  %p549_p6 = scmp.lt.u32.totalorder %s807_s28, %s858_s2 }
  0x66   : > { %p550_p13 = scmp.lt.u32.totalorder %s548_s18, %s544_s3  ;;  %p552_p8 = scmp.lt.u32.totalorder %s544_s3, %s807_s28 }
  0x67   : > { %p546_p11 = pnand %p545_p9, %p871_p0 }
  0x68   : > { %p551_p5 = por %p550_p13, %p549_p6 }
  0x69   : > { %p547_p3 = pneg %p546_p11 }
  0x6a   : > { %p553_p7 = por %p552_p8, %p551_p5 }
  0x6c   : > { %p554_p4 = pnand %p553_p7, %p547_p3 }
  0x6e   : > { %557 = shalt.err (!%p554_p4)
}
  0x6f   : > { %406 = dma.vmem_to_hbm [thread:$0]  (%p871_p0), %s809_s30, 128, %s807_s28, %s265_s21  }
  0x70 PF: > { %s291_s5 = sand.u32 1, %s596_s9   ;;  %p872_p10 = scmp.ne.s32.totalorder %s864_s24, 0 }
  0x71   : > { %p873_p12 = scmp.ge.s32.totalorder %s616_s14, 2  ;;  %s292_s16 = scalar_lea.sflag [#allocation4], %s291_s5 }
  0x73   : > { %p416_p1 = pnand %p873_p12, %p872_p10 }
  0x75   : > { %591 = dma.done.wait (!%p416_p1), %s292_s16, 128  }
  0x76   : > { %593 = vsyncadd (!%p416_p1), %s292_s16, 4294967168  ;;  %s21_s14 = sadd.s32 1, %s616_s14   ;;  %s874_s9 = smov %s600_s10 }
  0x77   : > { %p18_p2 = scmp.ge.s32.totalorder %s21_s14, 4   ;;  %s875_s10 = smov %s604_s11 }
  0x78   : > { %s876_s11 = smov %s692_s23  ;;  %s877_s12 = smov %s612_s13 }
  0x79   : > { %s878_s13 = smov %s880_s17  ;;  %20 = sbr.rel (!%p18_p2) target bundleno = 8 (0x8), region = 90 }
  0x80   :  { %297 = vsyncpa [#allocation3], 1 }
  0x81   :  { %299 = vsyncpa [#allocation3 + $0x1], 1 }
  0x82   :  { %300 = vsyncpa [#allocation6], 1 }
  0x83   :  { %302 = vsyncpa [#allocation6 + $0x1], 1 }
  0x84   :  { %303 = vsyncpa [#allocation4], 1 }
  0x85   :  { %305 = vsyncpa [#allocation4 + $0x1], 1 }

</bundles_post_ra>
